<compile_context>
chip_gen: v6e
topology: v6e:2x2x1
jax: 0.10.0
libtpu: 0.0.40
codegen_flags: <defaults>
</compile_context>

<pallas_src>
import functools

import jax
import jax.numpy as jnp
from jax.experimental import pallas as pl
from jax.experimental.pallas import tpu as pltpu


# --------------------------------------------------------------------------
# Kernel 1: streaming global-average-pool over the spatial axis.
# x block: (b_tile, c_tile, hw_tile)  -> pooled block: (b_tile, c_tile) f32
# --------------------------------------------------------------------------
def _pool_kernel(x_ref, o_ref, acc_ref, *, inv_hw, hw, hw_tile, lanes, mask_needed):
    s = pl.program_id(2)

    @pl.when(s == 0)
    def _init():
        acc_ref[...] = jnp.zeros_like(acc_ref)

    x = x_ref[...]                                        # (b_tile, c_tile, hw_tile)
    if mask_needed:
        # Ragged spatial tail: the padded region of the last block holds stale
        # VMEM data; zero it so it does not perturb the running sum.
        idx = s * hw_tile + jax.lax.broadcasted_iota(jnp.int32, x.shape, 2)
        x = jnp.where(idx < hw, x, jnp.zeros_like(x))

    # Per-lane partial sums: pure VPU adds over 128-wide lane chunks, converted
    # to f32 chunk-by-chunk (no full-tile f32 copy).  The single cross-lane
    # (XLU) reduce happens once, in the epilogue below.
    partial = x[:, :, 0:lanes].astype(jnp.float32)
    for k in range(1, hw_tile // lanes):
        partial = partial + x[:, :, k * lanes:(k + 1) * lanes].astype(jnp.float32)
    acc_ref[...] += partial

    @pl.when(s == pl.num_programs(2) - 1)
    def _epilogue():
        o_ref[...] = (jnp.sum(acc_ref[...], axis=-1) * inv_hw).astype(o_ref.dtype)


# --------------------------------------------------------------------------
# Kernel 2: the tiny gate MLP  sigmoid(relu(p @ W1^T + b1) @ W2^T + b2).
# Everything lives in VMEM; weights are resident (constant index map).
# --------------------------------------------------------------------------
def _gate_kernel(p_ref, w1_ref, b1_ref, w2_ref, b2_ref, o_ref):
    pooled = p_ref[...]                                   # (bg, C) f32
    h = jnp.dot(pooled, w1_ref[...], preferred_element_type=jnp.float32)
    h = jnp.maximum(h + b1_ref[...].astype(jnp.float32), 0.0)
    g = jnp.dot(h, w2_ref[...], preferred_element_type=jnp.float32)
    g = g + b2_ref[...].astype(jnp.float32)
    o_ref[...] = jax.nn.sigmoid(g).astype(o_ref.dtype)


def _vmem_budget():
    """Per-generation (x-tile cap, scoped VMEM limit) in bytes."""
    cap = None
    get_info = getattr(pltpu, "get_tpu_info", None)
    if get_info is not None:
        try:
            cap = getattr(get_info(), "vmem_capacity_bytes", None)
        except Exception:
            cap = None
    if cap is None:
        cap = 64 * 1024 * 1024                 # assume the tightest (v7x per-TC)
    if cap >= 100 * 1024 * 1024:               # v5e / v6e: 128 MiB physical VMEM
        return 20 * 1024 * 1024, 64 * 1024 * 1024
    return 10 * 1024 * 1024, 48 * 1024 * 1024  # v7x: 64 MiB per TensorCore


def squeeze_excitation(x, w1, b1, w2, b2):
    """x: (B, C, H, W) NCHW.  w1: (Cr, C), b1: (Cr,), w2: (C, Cr), b2: (C,).

    Returns (B, C, 1, 1) sigmoid gates, matching the PyTorch module's forward.
    """
    B, C, H, W = x.shape
    Cr = w1.shape[0]
    HW = H * W
    itemsize = jnp.dtype(x.dtype).itemsize
    x_tile_cap, vmem_limit = _vmem_budget()

    # Native-layout view: (B, C, H, W) -> (B, C, HW) is a free reshape (no HBM
    # copy).  HW -> lanes, C -> sublanes / parallel grid axis.
    x_bchw = x.reshape(B, C, HW)

    # ---------------- pooling kernel tiling ----------------
    b_tile = min(B, 8)                         # cdiv grid handles any B (no padding)

    # Channel blocking: multiples of 128 keep the pooled-output block lane-dense
    # and widen the (batch x channel) parallel grid (feeds both v7x TensorCores
    # even at B=1).  Fall back to the full channel extent otherwise (always legal).
    if C % 128 == 0 and C > 128:
        c_tile = min(C, 512)
    else:
        c_tile = C

    # Spatial tile: as large as the per-buffer cap allows (multiple of 128 lanes
    # for lane-dense, unmasked loads), or the full extent when it fits.
    bytes_per_hw = b_tile * c_tile * itemsize
    hw_budget = max(128, (x_tile_cap // bytes_per_hw) // 128 * 128)
    hw_tile = HW if HW <= hw_budget else hw_budget
    n_hw = pl.cdiv(HW, hw_tile)
    mask_needed = (HW % hw_tile) != 0
    lanes = 128 if hw_tile % 128 == 0 else hw_tile

    grid = (pl.cdiv(B, b_tile), pl.cdiv(C, c_tile), n_hw)

    pool_cost = pl.CostEstimate(
        flops=B * C * HW,
        transcendentals=0,
        bytes_accessed=x_bchw.size * itemsize + B * C * 4,
    )

    pooled = pl.pallas_call(
        functools.partial(_pool_kernel, inv_hw=1.0 / float(HW), hw=HW,
                          hw_tile=hw_tile, lanes=lanes, mask_needed=mask_needed),
        out_shape=jax.ShapeDtypeStruct((B, C), jnp.float32),
        grid_spec=pltpu.PrefetchScalarGridSpec(
            num_scalar_prefetch=0,
            grid=grid,
            in_specs=[
                pl.BlockSpec((b_tile, c_tile, hw_tile), lambda b, c, s: (b, c, s)),
            ],
            out_specs=pl.BlockSpec((b_tile, c_tile), lambda b, c, s: (b, c)),
            scratch_shapes=[pltpu.VMEM((b_tile, c_tile, lanes), jnp.float32)],
        ),
        compiler_params=pltpu.CompilerParams(
            dimension_semantics=("parallel", "parallel", "arbitrary"),
            vmem_limit_bytes=vmem_limit,
        ),
        cost_estimate=pool_cost,
    )(x_bchw)

    # ---------------- gate kernel (tiny) ----------------
    # Pre-transpose weights so the kernel does plain row-major matmuls
    # (torch Linear is y = x @ W.T + b).  These are tiny (C*Cr) arrays.
    w1_t = w1.T                      # (C, Cr)
    w2_t = w2.T                      # (Cr, C)
    b1_2d = b1.reshape(1, Cr)
    b2_2d = b2.reshape(1, C)

    bg = B if B <= 256 else 256
    gate_grid = (pl.cdiv(B, bg),)

    gate_cost = pl.CostEstimate(
        flops=4 * B * C * Cr,
        transcendentals=B * C,
        bytes_accessed=B * C * (4 + itemsize)
        + (w1.size + w2.size + b1.size + b2.size) * jnp.dtype(w1.dtype).itemsize,
    )

    gates = pl.pallas_call(
        _gate_kernel,
        out_shape=jax.ShapeDtypeStruct((B, C), x.dtype),
        grid_spec=pltpu.PrefetchScalarGridSpec(
            num_scalar_prefetch=0,
            grid=gate_grid,
            in_specs=[
                pl.BlockSpec((bg, C), lambda i: (i, 0)),
                pl.BlockSpec((C, Cr), lambda i: (0, 0)),
                pl.BlockSpec((1, Cr), lambda i: (0, 0)),
                pl.BlockSpec((Cr, C), lambda i: (0, 0)),
                pl.BlockSpec((1, C), lambda i: (0, 0)),
            ],
            out_specs=pl.BlockSpec((bg, C), lambda i: (i, 0)),
        ),
        compiler_params=pltpu.CompilerParams(
            dimension_semantics=("parallel",),
            vmem_limit_bytes=vmem_limit,
        ),
        cost_estimate=gate_cost,
    )(pooled, w1_t, b1_2d, w2_t, b2_2d)

    return gates.reshape(B, C, 1, 1)


def _reference(x, w1, b1, w2, b2):
    pooled = jnp.mean(x, axis=(2, 3))               # (B, C)
    h = jnp.maximum(pooled @ w1.T + b1, 0.0)
    g = jax.nn.sigmoid(h @ w2.T + b2)
    return g[:, :, None, None]


if __name__ == "__main__":
    B, C, H, W = 2, 8, 16, 16
    reduction_factor = 4
    Cr = C // reduction_factor

    key = jax.random.PRNGKey(0)
    kx, k1, k2, k3, k4 = jax.random.split(key, 5)

    x = jax.random.normal(kx, (B, C, H, W), dtype=jnp.float32)
    # Deterministic synthetic parameters (same shapes as the nn.Linear weights).
    w1 = jax.random.normal(k1, (Cr, C), dtype=jnp.float32) * 0.5   # squeeze.weight
    b1 = jax.random.normal(k2, (Cr,), dtype=jnp.float32) * 0.1     # squeeze.bias
    w2 = jax.random.normal(k3, (C, Cr), dtype=jnp.float32) * 0.5   # excitation.weight
    b2 = jax.random.normal(k4, (C,), dtype=jnp.float32) * 0.1      # excitation.bias

    out = squeeze_excitation(x, w1, b1, w2, b2)
    out = jax.block_until_ready(out)

    ref = _reference(x, w1, b1, w2, b2)
    assert out.shape == (B, C, 1, 1)
    assert jnp.allclose(out, ref, atol=1e-5, rtol=1e-5)

    print("KERNEL_OK")
</pallas_src>

<mosaic_0001>
module attributes {stable_mosaic.version = 11 : i64} {
  func.func @_pool_kernel(%arg0: i32, %arg1: i32, %arg2: i32, %arg3: memref<2x8x256xf32, #tpu.memory_space<vmem>>, %arg4: memref<2x8xf32, #tpu.memory_space<vmem>>, %arg5: memref<2x8x128xf32, #tpu.memory_space<vmem>>) attributes {dimension_semantics = [#tpu.dimension_semantics<parallel>, #tpu.dimension_semantics<parallel>, #tpu.dimension_semantics<arbitrary>], iteration_bounds = array<i64: 1, 1, 1>, scalar_prefetch = 0 : i64, scratch_operands = 1 : i64, tpu.core_type = #tpu.core_type<tc>, window_params = [{transform_indices = @transform_0, window_bounds = array<i64: 2, 8, 256>}, {transform_indices = @transform_1, window_bounds = array<i64: 2, 8>}]} {
    %c0_i32 = arith.constant 0 : i32
    %0 = arith.cmpi eq, %arg2, %c0_i32 : i32
    %1 = arith.extui %0 : i1 to i32
    %c0_i32_0 = arith.constant 0 : i32
    %2 = arith.cmpi ne, %1, %c0_i32_0 : i32
    scf.if %2 {
      %cst = arith.constant 0.000000e+00 : f32
      %13 = vector.broadcast %cst : f32 to vector<2x8x128xf32>
      %c0_11 = arith.constant 0 : index
      %c0_12 = arith.constant 0 : index
      %c0_13 = arith.constant 0 : index
      %14 = vector.load %arg5[%c0_11, %c0_12, %c0_13] : memref<2x8x128xf32, #tpu.memory_space<vmem>>, vector<2x8x128xf32>
      tpu.vector_store %arg5[%c0_11, %c0_12, %c0_13], %13 {strides = array<i32>} : memref<2x8x128xf32, #tpu.memory_space<vmem>>, vector<2x8x128xf32>,
    } else {
    }
    %c0 = arith.constant 0 : index
    %c0_1 = arith.constant 0 : index
    %c0_2 = arith.constant 0 : index
    %3 = vector.load %arg3[%c0, %c0_1, %c0_2] : memref<2x8x256xf32, #tpu.memory_space<vmem>>, vector<2x8x256xf32>
    %4 = vector.extract_strided_slice %3 {offsets = [0, 0, 0], sizes = [2, 8, 128], strides = [1, 1, 1]} : vector<2x8x256xf32> to vector<2x8x128xf32>
    %5 = vector.extract_strided_slice %3 {offsets = [0, 0, 128], sizes = [2, 8, 128], strides = [1, 1, 1]} : vector<2x8x256xf32> to vector<2x8x128xf32>
    %6 = arith.addf %4, %5 : vector<2x8x128xf32>
    %c0_3 = arith.constant 0 : index
    %c0_4 = arith.constant 0 : index
    %c0_5 = arith.constant 0 : index
    %7 = vector.load %arg5[%c0_3, %c0_4, %c0_5] : memref<2x8x128xf32, #tpu.memory_space<vmem>>, vector<2x8x128xf32>
    %8 = arith.addf %7, %6 : vector<2x8x128xf32>
    %c0_6 = arith.constant 0 : index
    %c0_7 = arith.constant 0 : index
    %c0_8 = arith.constant 0 : index
    %9 = vector.load %arg5[%c0_6, %c0_7, %c0_8] : memref<2x8x128xf32, #tpu.memory_space<vmem>>, vector<2x8x128xf32>
    tpu.vector_store %arg5[%c0_6, %c0_7, %c0_8], %8 {strides = array<i32>} : memref<2x8x128xf32, #tpu.memory_space<vmem>>, vector<2x8x128xf32>,
    %c0_i32_9 = arith.constant 0 : i32
    %10 = arith.cmpi eq, %arg2, %c0_i32_9 : i32
    %11 = arith.extui %10 : i1 to i32
    %c0_i32_10 = arith.constant 0 : i32
    %12 = arith.cmpi ne, %11, %c0_i32_10 : i32
    scf.if %12 {
      %c0_11 = arith.constant 0 : index
      %c0_12 = arith.constant 0 : index
      %c0_13 = arith.constant 0 : index
      %13 = vector.load %arg5[%c0_11, %c0_12, %c0_13] : memref<2x8x128xf32, #tpu.memory_space<vmem>>, vector<2x8x128xf32>
      %cst = arith.constant dense<0.000000e+00> : vector<2x8xf32>
      %14 = vector.multi_reduction <add>, %13, %cst [2] : vector<2x8x128xf32> to vector<2x8xf32>
      %cst_14 = arith.constant 3.906250e-03 : f32
      %15 = vector.broadcast %cst_14 : f32 to vector<2x8xf32>
      %16 = arith.mulf %14, %15 : vector<2x8xf32>
      %c0_15 = arith.constant 0 : index
      %c0_16 = arith.constant 0 : index
      %17 = vector.load %arg4[%c0_15, %c0_16] : memref<2x8xf32, #tpu.memory_space<vmem>>, vector<2x8xf32>
      tpu.vector_store %arg4[%c0_15, %c0_16], %16 {strides = array<i32>} : memref<2x8xf32, #tpu.memory_space<vmem>>, vector<2x8xf32>,
    } else {
    }
    return
  }
  func.func @transform_0(%arg0: i32, %arg1: i32, %arg2: i32) -> (i32, i32, i32) {
    %c0_i32 = arith.constant 0 : i32
    return %arg0, %arg1, %arg2 : i32, i32, i32
  }
  func.func @transform_1(%arg0: i32, %arg1: i32, %arg2: i32) -> (i32, i32) {
    %c0_i32 = arith.constant 0 : i32
    return %arg0, %arg1 : i32, i32
  }
}

</mosaic_0001>

<bundles_post_ra>
// kernel: tpu_custom_call.1
= control target key start
LH: loop header
LB: loop body
LE: loop exit
PB: predicated region body
PF: predicated region fallthrough
CT: control target
= control target key end

     0   :  { %6 = vsyncpa [#allocation4], 0  ;;  %s152_s0 = inlined_call_operand.hbm [shape: f32[2,8,256], index: 0, kind: input, shape index: {}]   ;;  %s153_s1 = inlined_call_operand.hbm [shape: f32[2,8], index: 1, kind: output, shape index: {}]  }
   0x1   :  { %7 = vsyncpa [#allocation5], 0  ;;  %s132_s6 = smov [#allocation3]  }
   0x2   :  { %s13_s7 = sshll.u32 %s132_s6, 4  ;;  %s14_s7 = int_to_ptr.vmem [resolvable:$true] %s13_s7 }
   0x3   :  { %s96_s8 = scalar_lea.vmem %s14_s7, 512  ;;  %p101_p1 = scmp.lt.s32.totalorder %s14_s7, %s14_s7 }
   0x4   :  { %p97_p0 = scmp.ne.s32.totalorder %s14_s7, %s96_s8  ;;  %p102_p2 = scmp.lt.s32.totalorder %s96_s8, %s96_s8 }
   0x6   :  { %p103_p3 = por %p102_p2, %p101_p1 }
   0x8   :  { %p104_p4 = pnand %p103_p3, %p97_p0 }
   0xa   :  { %107 = shalt.err (!%p104_p4)
}
   0xb   :  { %s133_s9 = smov 256   ;;  %s134_s10 = smov 16  }
   0xc   :  { %19 = dma.hbm_to_vmem [thread:$0]  %s152_s0, 512, %s14_s7, [#allocation4], %s133_s9, %s133_s9, %s134_s10  }
   0xd   :  { %128 = dma.done.wait [#allocation4], 512  }
   0xe   :  { %129 = vsyncadd [#allocation4], 4294966784  ;;  %v29_v0 = vld [vmem:[#allocation3] sm:$0xff]  ;;  %v30_v1 = vld [vmem:[#allocation3 + $0x8] sm:$0xff]  ;;  %v54_v6 = vlaneseq  ;;  %s135_s13 = smov [#allocation6]   ;;  %vm64_vm0 = vcmask 1041409  }
   0xf   :  { %v31_v2 = vld [vmem:[#allocation3 + $0x10] sm:$0xff]  ;;  %v33_v3 = vadd.f32 %v30_v1, %v29_v0  ;;  %v32_v4 = vld [vmem:[#allocation3 + $0x18] sm:$0xff]  ;;  %s75_s0 = sshll.u32 %s135_s13, 4  ;;  %vm67_vm1 = vcmask 58368   ;;  %s76_s0 = int_to_ptr.vmem [resolvable:$true] %s75_s0 }
  0x10   :  { %v34_v5 = vadd.f32 %v32_v4, %v31_v2  ;;  %v55_v7 = vand.u32 127, %v54_v6  ;;  %v57_v8 = vshrl.u32 %v54_v6, 7  ;;  %s108_s14 = scalar_lea.vmem %s76_s0, 32  ;;  %p113_p6 = scmp.lt.s32.totalorder %s76_s0, %s76_s0 }
  0x11   :  { %46 = vadd.xlane.f32.xlu0 %v33_v3  ;;  %p109_p5 = scmp.ne.s32.totalorder %s76_s0, %s108_s14  ;;  %p114_p7 = scmp.lt.s32.totalorder %s108_s14, %s108_s14 }
  0x12   :  { %v58_v10 = vsub.s32 %v55_v7, %v57_v8 }
  0x13   :  { %p115_p8 = por %p114_p7, %p113_p6 }
  0x15   :  { %48 = vadd.xlane.f32.xlu0 %v34_v5  ;;  %p116_p9 = pnand %p115_p8, %p109_p5 }
  0x9a   :  { %v47_v9 = vpop.xlane.xlu0 %46 }
  0x9b   :  { %v50_v11 = vmul.f32 0.00390625, %v47_v9 }
  0x9d   :  { %v59_v14 = vrot.slane %v50_v11, %v58_v10 }
  0x9e   :  { %v49_v12 = vpop.xlane.xlu0 %48 }
  0x9f   :  { %v51_v13 = vmul.f32 0.00390625, %v49_v12 }
  0xa1   :  { %v63_v15 = vrot.slane %v51_v13, %v58_v10 }
  0xa3   :  { %v65_v16 = vsel %vm64_vm0, %v63_v15, %v59_v14 }
  0xa4   :  { %68 = vst.msk [vmem:[#allocation6] sm:$0x3] %vm67_vm1, %v65_v16 }
  0xa5   :  { %119 = shalt.err (!%p116_p9)
}
  0xa6   :  { %78 = dma.vmem_to_hbm [thread:$0]  %s76_s0, 32, %s153_s1, [#allocation5]  }
  0xa7   :  { %130 = dma.done.wait [#allocation5], 32  }
  0xa8   :  { %131 = vsyncadd [#allocation5], 4294967264 }
  0xa9   :  { %82 = vsyncpa [#allocation4], 1 }
  0xaa   :  { %83 = vsyncpa [#allocation5], 1 }

</bundles_post_ra>
